<compile_context>
chip_gen: v7x
topology: tpu7x:2x2x1
jax: 0.10.0
libtpu: 0.0.40
codegen_flags: <defaults>
</compile_context>

<pallas_src>
import functools
import math

import jax
import jax.numpy as jnp
from jax.experimental import pallas as pl
from jax.experimental.pallas import tpu as pltpu


# ------------------------------ spike quantizer ------------------------------

def _spike(t, min_value=0.0, max_value=4.0, inv_norm=0.25):
    # MultiSpike forward: round(clamp(x, min, max)) / Norm   (Norm == max_value)
    # The divide is folded into a multiply (exact: 1/4 is a power of two).
    return jnp.round(jnp.clip(t, min_value, max_value)) * inv_norm


# ------------------------------ Pallas kernel --------------------------------

def ms_attention_kernel(x_ref, wqkv_ref, bqkv_ref, mask_ref, wp_ref, bp_ref, o_ref):
    # x_ref:    (1, C, N)  f32    one batch element, channels-first
    # wqkv_ref: (2C+Cv, C) bf16   fused [q; k; v] 1x1-conv + folded-BN weight
    # bqkv_ref: (2C+Cv, 1) f32    fused bias
    # mask_ref: (Cv, C)    f32    block-diagonal per-head mask * scale
    # wp_ref:   (C, Cv)    bf16   proj conv + folded BN
    # bp_ref:   (C, 1)     f32
    # o_ref:    (1, C, N)  f32
    C, Cv = wp_ref.shape

    # head_spike; spiked values are exact multiples of 0.25 -> bf16 is lossless.
    xs = _spike(x_ref[0]).astype(jnp.bfloat16)                          # (C, N)

    # Fused q/k/v projection: ONE (2C+Cv, C) x (C, N) bf16 MXU matmul,
    # f32 accumulation; bias added once per grid step.
    qkv = jnp.dot(wqkv_ref[...], xs,
                  preferred_element_type=jnp.float32) + bqkv_ref[...]   # (2C+Cv, N)
    qkv = _spike(qkv)                                                   # multiples of 0.25
    q = qkv[:C].astype(jnp.bfloat16)          # static sublane slices (C, Cv % 8 == 0)
    k = qkv[C:2 * C].astype(jnp.bfloat16)     # lossless bf16 casts
    v = qkv[2 * C:].astype(jnp.bfloat16)

    # Linear attention, rewritten by associativity:
    #   out = ((q @ k^T) * scale) @ v  ==  ((v @ k^T) . head_mask * scale) @ q
    # kv is only (Cv, C); the N x N attention matrix never exists.
    kv = jnp.einsum("vn,cn->vc", v, k,
                    preferred_element_type=jnp.float32)                 # (Cv, C) exact f32
    kv = kv * mask_ref[...]                                             # block-diag * scale

    # Exact 2-term bf16 split of kv so the attn matmul uses the bf16 MXU path
    # (avoids the 3-6x slower f32-operand matmul).  For spiked inputs the
    # split reproduces kv exactly (needs <= 16 mantissa bits for N <= 4096).
    kv_hi = kv.astype(jnp.bfloat16)
    kv_lo = (kv - kv_hi.astype(jnp.float32)).astype(jnp.bfloat16)
    attn = (jnp.dot(kv_hi, q, preferred_element_type=jnp.float32)
            + jnp.dot(kv_lo, q, preferred_element_type=jnp.float32))    # (Cv, N) f32
    attn = _spike(attn).astype(jnp.bfloat16)                            # attn_spike, lossless

    # proj 1x1 conv + folded BN; lane-dense (C, N) store.
    o_ref[0] = jnp.dot(wp_ref[...], attn,
                       preferred_element_type=jnp.float32) + bp_ref[...]


# ------------------------------ host wrapper ---------------------------------

def fold_bn(w_conv, gamma, beta, mean, var, eps=1e-5):
    """Fold Conv2d(1x1, no bias) + BatchNorm2d (eval) into (W, b) for  W @ x + b.

    w_conv: (C_out, C_in) -> W: (C_out, C_in) bf16,  b: (C_out, 1) f32.
    Weights are stored bf16 for the native MXU datapath (f32 accumulation);
    the plain-JAX reference uses the same bf16 weights.
    """
    s = gamma / jnp.sqrt(var + eps)                     # (C_out,)
    W = (w_conv * s[:, None]).astype(jnp.bfloat16)      # (C_out, C_in)
    b = (beta - mean * s).astype(jnp.float32)[:, None]  # (C_out, 1)
    return W, b


@functools.partial(jax.jit, static_argnames=("num_heads",))
def ms_attention_linear(x_nchw, params, *, num_heads):
    B, C, H, W = x_nchw.shape
    N = H * W
    wq, bq = params["q"]
    wk, bk = params["k"]
    wv, bv = params["v"]
    wp, bp = params["p"]
    Cv = wv.shape[0]
    assert C % num_heads == 0, f"dim {C} must divide num_heads {num_heads}"
    assert Cv % num_heads == 0, f"dim_v {Cv} must divide num_heads {num_heads}"
    hd, hdv = C // num_heads, Cv // num_heads
    scale = hd ** -0.5
    Ctot = 2 * C + Cv

    # Fused QKV operands (tiny host-side concat; production callers would prefuse).
    wqkv = jnp.concatenate([wq, wk, wv], axis=0)         # (Ctot, C)  bf16
    bqkv = jnp.concatenate([bq, bk, bv], axis=0)         # (Ctot, 1)  f32

    # Pre-scaled block-diagonal head mask: v-channel dv and q/k-channel c
    # interact only when they belong to the same head.
    vhead = (jnp.arange(Cv, dtype=jnp.int32) // hdv)[:, None]
    qhead = (jnp.arange(C, dtype=jnp.int32) // hd)[None, :]
    mask_scale = (vhead == qhead).astype(jnp.float32) * scale   # (Cv, C)

    # NCHW -> (B, C, N) is a free reshape: channels-first end to end,
    # no host transposes around the pallas_call.
    x = x_nchw.reshape(B, C, N).astype(jnp.float32)

    def const_spec(a):
        # Grid-invariant operand: constant block index -> fetched once,
        # not re-DMA'd across grid steps.
        return pl.BlockSpec(a.shape, lambda i: (0,) * a.ndim)

    # ---- explicit per-generation VMEM budget --------------------------------
    io_blk = C * N * 4                                   # one f32 (C, N) slab
    w_bytes = 2 * (Ctot * C + C * Cv) + 4 * (Ctot + C + Cv * C)
    tmp_bytes = 6 * Ctot * N + 8 * Cv * N + 16 * Cv * C  # in-kernel temporaries (rough)
    vmem_limit = int(min(max(4 * io_blk            # double-buffered x + out
                             + 2 * w_bytes + tmp_bytes + (2 << 20),
                             16 << 20),            # floor: v5e default scoped is 16 MiB
                         48 << 20))                # cap: headroom on v7x's 64 MiB VMEM

    flops = 2 * B * N * C * (Ctot + 4 * Cv)
    bytes_accessed = (2 * B * C * N * 4                  # x in + out (f32)
                      + 2 * (Ctot * C + C * Cv)          # bf16 weights
                      + 4 * (Ctot + C + Cv * C))         # f32 biases + mask

    out = pl.pallas_call(
        ms_attention_kernel,
        out_shape=jax.ShapeDtypeStruct((B, C, N), jnp.float32),
        grid_spec=pltpu.PrefetchScalarGridSpec(
            num_scalar_prefetch=0,
            grid=(B,),                                   # >= 2 steps/core on v7x when B >= 4
            in_specs=[
                pl.BlockSpec((1, C, N), lambda i: (i, 0, 0)),   # x (per-batch slab)
                const_spec(wqkv), const_spec(bqkv),             # fused QKV conv+BN
                const_spec(mask_scale),                         # head mask * scale
                const_spec(wp), const_spec(bp),                 # proj conv+BN
            ],
            # Lane-dense output: last dim N (multiple of 128 in the demo) -> unmasked vst.
            out_specs=pl.BlockSpec((1, C, N), lambda i: (i, 0, 0)),
        ),
        compiler_params=pltpu.CompilerParams(
            dimension_semantics=("parallel",),           # megacore / v7x: split batch
            vmem_limit_bytes=vmem_limit),
        cost_estimate=pl.CostEstimate(flops=int(flops), transcendentals=0,
                                      bytes_accessed=int(bytes_accessed)),
    )(x, wqkv, bqkv, mask_scale, wp, bp)

    # (B, C, N) -> NCHW is again a free reshape.
    return out.reshape(B, C, H, W)


# ------------------------------ reference (plain JAX) ------------------------
# Faithful to the PyTorch forward: per-head (q @ k^T * scale) @ v, channels-last.

def reference(x_nchw, params, *, num_heads):
    B, C, H, W = x_nchw.shape
    N = H * W
    wq, bq = params["q"]
    wk, bk = params["k"]
    wv, bv = params["v"]
    wp, bp = params["p"]
    Cv = wv.shape[0]
    hd, hdv = C // num_heads, Cv // num_heads
    scale = hd ** -0.5
    f32 = lambda w: w.astype(jnp.float32)

    xs = _spike(jnp.transpose(x_nchw.reshape(B, C, N), (0, 2, 1)))     # (B,N,C)
    q = _spike(xs @ f32(wq).T + bq[:, 0])
    k = _spike(xs @ f32(wk).T + bk[:, 0])
    v = _spike(xs @ f32(wv).T + bv[:, 0])
    q = q.reshape(B, N, num_heads, hd).transpose(0, 2, 1, 3)
    k = k.reshape(B, N, num_heads, hd).transpose(0, 2, 1, 3)
    v = v.reshape(B, N, num_heads, hdv).transpose(0, 2, 1, 3)
    attn = jnp.einsum("bhqd,bhkd->bhqk", q, k) * scale
    o = jnp.einsum("bhqk,bhkd->bhqd", attn, v)
    o = o.transpose(0, 2, 1, 3).reshape(B, N, Cv)
    o = _spike(o)
    o = o @ f32(wp).T + bp[:, 0]
    return jnp.transpose(o, (0, 2, 1)).reshape(B, C, H, W)


# ------------------------------ main ------------------------------------------

if __name__ == "__main__":
    key = jax.random.PRNGKey(0)
    # N = H*W = 256 (multiple of 128 -> lane-dense stores); B = 4 -> 4 grid
    # steps (2 per TensorCore on v7x); head_dim = 4 -> scale = 0.5 (exact).
    B, C, H, W = 4, 32, 16, 16
    num_heads = 8
    lamda_ratio = 2
    Cv = int(C * lamda_ratio)

    keys = jax.random.split(key, 16)
    # Input values spread so the quantizer hits several levels.
    x = jax.random.normal(keys[0], (B, C, H, W), jnp.float32) * 2.0 + 1.0

    def make_conv_bn(kw, kg, kb, c_in, c_out):
        w_conv = jax.random.normal(kw, (c_out, c_in), jnp.float32) / math.sqrt(c_in)
        gamma = 1.0 + 0.1 * jax.random.normal(kg, (c_out,), jnp.float32)
        beta = 0.1 * jax.random.normal(kb, (c_out,), jnp.float32)
        mean = jnp.zeros((c_out,), jnp.float32)
        var = jnp.ones((c_out,), jnp.float32)
        Wf, b = fold_bn(w_conv, gamma, beta, mean, var)
        # Demo-only: snap the folded weights/biases onto coarse dyadic grids so
        # every partial sum in both the kernel and the reference is exactly
        # representable in f32 -> bit-identical spike decisions (the accuracy
        # check cannot be flipped by accumulation-order rounding).
        Wq = jnp.clip(jnp.round(Wf.astype(jnp.float32) * 64.0), -127, 127) / 64.0
        bq_ = jnp.clip(jnp.round(b * 256.0), -256, 256) / 256.0
        return Wq.astype(jnp.bfloat16), bq_.astype(jnp.float32)

    params = {
        "q": make_conv_bn(keys[1], keys[2], keys[3], C, C),
        "k": make_conv_bn(keys[4], keys[5], keys[6], C, C),
        "v": make_conv_bn(keys[7], keys[8], keys[9], C, Cv),
        "p": make_conv_bn(keys[10], keys[11], keys[12], Cv, C),
    }

    out = jax.block_until_ready(ms_attention_linear(x, params, num_heads=num_heads))
    ref = jax.block_until_ready(reference(x, params, num_heads=num_heads))

    assert out.shape == (B, C, H, W)
    err = float(jnp.max(jnp.abs(out - ref)))
    assert err < 1e-4, f"max abs err = {err}"
    print("KERNEL_OK")
</pallas_src>

<mosaic_0001>
module attributes {stable_mosaic.version = 11 : i64} {
  func.func @ms_attention_kernel(%arg0: i32, %arg1: memref<1x32x256xf32, #tpu.memory_space<vmem>>, %arg2: memref<128x32xbf16, #tpu.memory_space<vmem>>, %arg3: memref<128x1xf32, #tpu.memory_space<vmem>>, %arg4: memref<64x32xf32, #tpu.memory_space<vmem>>, %arg5: memref<32x64xbf16, #tpu.memory_space<vmem>>, %arg6: memref<32x1xf32, #tpu.memory_space<vmem>>, %arg7: memref<1x32x256xf32, #tpu.memory_space<vmem>>) attributes {dimension_semantics = [#tpu.dimension_semantics<parallel>], iteration_bounds = array<i64: 4>, scalar_prefetch = 0 : i64, scratch_operands = 0 : i64, tpu.core_type = #tpu.core_type<tc>, window_params = [{transform_indices = @transform_0, window_bounds = array<i64: 1, 32, 256>}, {pipeline_mode = #tpu.pipeline_mode<synchronous>, transform_indices = @transform_1, window_bounds = array<i64: 128, 32>}, {pipeline_mode = #tpu.pipeline_mode<synchronous>, transform_indices = @transform_2, window_bounds = array<i64: 128, 1>}, {pipeline_mode = #tpu.pipeline_mode<synchronous>, transform_indices = @transform_3, window_bounds = array<i64: 64, 32>}, {pipeline_mode = #tpu.pipeline_mode<synchronous>, transform_indices = @transform_4, window_bounds = array<i64: 32, 64>}, {pipeline_mode = #tpu.pipeline_mode<synchronous>, transform_indices = @transform_5, window_bounds = array<i64: 32, 1>}, {transform_indices = @transform_6, window_bounds = array<i64: 1, 32, 256>}]} {
    %c0 = arith.constant 0 : index
    %c0_0 = arith.constant 0 : index
    %c0_1 = arith.constant 0 : index
    %0 = vector.load %arg1[%c0, %c0_0, %c0_1] : memref<1x32x256xf32, #tpu.memory_space<vmem>>, vector<1x32x256xf32>
    %1 = vector.shape_cast %0 : vector<1x32x256xf32> to vector<32x256xf32>
    %cst = arith.constant 0.000000e+00 : f32
    %cst_2 = arith.constant 4.000000e+00 : f32
    %2 = vector.broadcast %cst : f32 to vector<32x256xf32>
    %3 = arith.maximumf %2, %1 : vector<32x256xf32>
    %4 = vector.broadcast %cst_2 : f32 to vector<32x256xf32>
    %5 = arith.minimumf %4, %3 : vector<32x256xf32>
    %6 = math.roundeven %5 : vector<32x256xf32>
    %cst_3 = arith.constant 2.500000e-01 : f32
    %7 = vector.broadcast %cst_3 : f32 to vector<32x256xf32>
    %8 = arith.mulf %6, %7 : vector<32x256xf32>
    %9 = arith.truncf %8 : vector<32x256xf32> to vector<32x256xbf16>
    %c0_4 = arith.constant 0 : index
    %c0_5 = arith.constant 0 : index
    %10 = vector.load %arg2[%c0_4, %c0_5] : memref<128x32xbf16, #tpu.memory_space<vmem>>, vector<128x32xbf16>
    %cst_6 = arith.constant dense<0.000000e+00> : vector<128x256xf32>
    %11 = tpu.matmul %10, %9, %cst_6 {dimension_numbers = #tpu.dot_dimension_numbers<[1], [0], [0], [1], [0, 0, 1, 1], [], []>} : vector<128x32xbf16>, vector<32x256xbf16>, vector<128x256xf32> -> vector<128x256xf32>
    %c0_7 = arith.constant 0 : index
    %c0_8 = arith.constant 0 : index
    %12 = vector.load %arg3[%c0_7, %c0_8] : memref<128x1xf32, #tpu.memory_space<vmem>>, vector<128x1xf32>
    %13 = vector.broadcast %12 : vector<128x1xf32> to vector<128x256xf32>
    %14 = arith.addf %11, %13 : vector<128x256xf32>
    %cst_9 = arith.constant 0.000000e+00 : f32
    %cst_10 = arith.constant 4.000000e+00 : f32
    %15 = vector.broadcast %cst_9 : f32 to vector<128x256xf32>
    %16 = arith.maximumf %15, %14 : vector<128x256xf32>
    %17 = vector.broadcast %cst_10 : f32 to vector<128x256xf32>
    %18 = arith.minimumf %17, %16 : vector<128x256xf32>
    %19 = math.roundeven %18 : vector<128x256xf32>
    %cst_11 = arith.constant 2.500000e-01 : f32
    %20 = vector.broadcast %cst_11 : f32 to vector<128x256xf32>
    %21 = arith.mulf %19, %20 : vector<128x256xf32>
    %22 = vector.extract_strided_slice %21 {offsets = [0, 0], sizes = [32, 256], strides = [1, 1]} : vector<128x256xf32> to vector<32x256xf32>
    %23 = arith.truncf %22 : vector<32x256xf32> to vector<32x256xbf16>
    %24 = vector.extract_strided_slice %21 {offsets = [32, 0], sizes = [32, 256], strides = [1, 1]} : vector<128x256xf32> to vector<32x256xf32>
    %25 = arith.truncf %24 : vector<32x256xf32> to vector<32x256xbf16>
    %26 = vector.extract_strided_slice %21 {offsets = [64, 0], sizes = [64, 256], strides = [1, 1]} : vector<128x256xf32> to vector<64x256xf32>
    %27 = arith.truncf %26 : vector<64x256xf32> to vector<64x256xbf16>
    "tpu.trace_start"() <{level = 10 : i32, message = "vn,cn->vc"}> : () -> ()
    %cst_12 = arith.constant dense<0.000000e+00> : vector<64x32xf32>
    %28 = tpu.matmul %27, %25, %cst_12 {dimension_numbers = #tpu.dot_dimension_numbers<[1], [1], [0], [0], [0, 0, 1, 0], [], []>} : vector<64x256xbf16>, vector<32x256xbf16>, vector<64x32xf32> -> vector<64x32xf32>
    "tpu.trace_stop"() : () -> ()
    %c0_13 = arith.constant 0 : index
    %c0_14 = arith.constant 0 : index
    %29 = vector.load %arg4[%c0_13, %c0_14] : memref<64x32xf32, #tpu.memory_space<vmem>>, vector<64x32xf32>
    %30 = arith.mulf %28, %29 : vector<64x32xf32>
    %31 = arith.truncf %30 : vector<64x32xf32> to vector<64x32xbf16>
    %32 = arith.extf %31 : vector<64x32xbf16> to vector<64x32xf32>
    %33 = arith.subf %30, %32 : vector<64x32xf32>
    %34 = arith.truncf %33 : vector<64x32xf32> to vector<64x32xbf16>
    %cst_15 = arith.constant dense<0.000000e+00> : vector<64x256xf32>
    %35 = tpu.matmul %31, %23, %cst_15 {dimension_numbers = #tpu.dot_dimension_numbers<[1], [0], [0], [1], [0, 0, 1, 1], [], []>} : vector<64x32xbf16>, vector<32x256xbf16>, vector<64x256xf32> -> vector<64x256xf32>
    %cst_16 = arith.constant dense<0.000000e+00> : vector<64x256xf32>
    %36 = tpu.matmul %34, %23, %cst_16 {dimension_numbers = #tpu.dot_dimension_numbers<[1], [0], [0], [1], [0, 0, 1, 1], [], []>} : vector<64x32xbf16>, vector<32x256xbf16>, vector<64x256xf32> -> vector<64x256xf32>
    %37 = arith.addf %35, %36 : vector<64x256xf32>
    %cst_17 = arith.constant 0.000000e+00 : f32
    %cst_18 = arith.constant 4.000000e+00 : f32
    %38 = vector.broadcast %cst_17 : f32 to vector<64x256xf32>
    %39 = arith.maximumf %38, %37 : vector<64x256xf32>
    %40 = vector.broadcast %cst_18 : f32 to vector<64x256xf32>
    %41 = arith.minimumf %40, %39 : vector<64x256xf32>
    %42 = math.roundeven %41 : vector<64x256xf32>
    %cst_19 = arith.constant 2.500000e-01 : f32
    %43 = vector.broadcast %cst_19 : f32 to vector<64x256xf32>
    %44 = arith.mulf %42, %43 : vector<64x256xf32>
    %45 = arith.truncf %44 : vector<64x256xf32> to vector<64x256xbf16>
    %c0_20 = arith.constant 0 : index
    %c0_21 = arith.constant 0 : index
    %46 = vector.load %arg5[%c0_20, %c0_21] : memref<32x64xbf16, #tpu.memory_space<vmem>>, vector<32x64xbf16>
    %cst_22 = arith.constant dense<0.000000e+00> : vector<32x256xf32>
    %47 = tpu.matmul %46, %45, %cst_22 {dimension_numbers = #tpu.dot_dimension_numbers<[1], [0], [0], [1], [0, 0, 1, 1], [], []>} : vector<32x64xbf16>, vector<64x256xbf16>, vector<32x256xf32> -> vector<32x256xf32>
    %c0_23 = arith.constant 0 : index
    %c0_24 = arith.constant 0 : index
    %48 = vector.load %arg6[%c0_23, %c0_24] : memref<32x1xf32, #tpu.memory_space<vmem>>, vector<32x1xf32>
    %49 = vector.broadcast %48 : vector<32x1xf32> to vector<32x256xf32>
    %50 = arith.addf %47, %49 : vector<32x256xf32>
    %c0_25 = arith.constant 0 : index
    %c0_26 = arith.constant 0 : index
    %c0_27 = arith.constant 0 : index
    %51 = vector.load %arg7[%c0_25, %c0_26, %c0_27] : memref<1x32x256xf32, #tpu.memory_space<vmem>>, vector<1x32x256xf32>
    %52 = vector.shape_cast %51 : vector<1x32x256xf32> to vector<32x256xf32>
    %53 = vector.shape_cast %50 : vector<32x256xf32> to vector<1x32x256xf32>
    tpu.vector_store %arg7[%c0_25, %c0_26, %c0_27], %53 {strides = array<i32>} : memref<1x32x256xf32, #tpu.memory_space<vmem>>, vector<1x32x256xf32>,
    return
  }
  func.func @transform_0(%arg0: i32) -> (i32, i32, i32) {
    %c0_i32 = arith.constant 0 : i32
    %c0_i32_0 = arith.constant 0 : i32
    %c0_i32_1 = arith.constant 0 : i32
    return %arg0, %c0_i32, %c0_i32_0 : i32, i32, i32
  }
  func.func @transform_1(%arg0: i32) -> (i32, i32) {
    %c0_i32 = arith.constant 0 : i32
    %c0_i32_0 = arith.constant 0 : i32
    %c0_i32_1 = arith.constant 0 : i32
    return %c0_i32, %c0_i32_0 : i32, i32
  }
  func.func @transform_2(%arg0: i32) -> (i32, i32) {
    %c0_i32 = arith.constant 0 : i32
    %c0_i32_0 = arith.constant 0 : i32
    %c0_i32_1 = arith.constant 0 : i32
    return %c0_i32, %c0_i32_0 : i32, i32
  }
  func.func @transform_3(%arg0: i32) -> (i32, i32) {
    %c0_i32 = arith.constant 0 : i32
    %c0_i32_0 = arith.constant 0 : i32
    %c0_i32_1 = arith.constant 0 : i32
    return %c0_i32, %c0_i32_0 : i32, i32
  }
  func.func @transform_4(%arg0: i32) -> (i32, i32) {
    %c0_i32 = arith.constant 0 : i32
    %c0_i32_0 = arith.constant 0 : i32
    %c0_i32_1 = arith.constant 0 : i32
    return %c0_i32, %c0_i32_0 : i32, i32
  }
  func.func @transform_5(%arg0: i32) -> (i32, i32) {
    %c0_i32 = arith.constant 0 : i32
    %c0_i32_0 = arith.constant 0 : i32
    %c0_i32_1 = arith.constant 0 : i32
    return %c0_i32, %c0_i32_0 : i32, i32
  }
  func.func @transform_6(%arg0: i32) -> (i32, i32, i32) {
    %c0_i32 = arith.constant 0 : i32
    %c0_i32_0 = arith.constant 0 : i32
    %c0_i32_1 = arith.constant 0 : i32
    return %arg0, %c0_i32, %c0_i32_0 : i32, i32, i32
  }
}

</mosaic_0001>

<bundles_post_ra>
// kernel: ms_attention_linear.1
= control target key start
LH: loop header
LB: loop body
LE: loop exit
PB: predicated region body
PF: predicated region fallthrough
CT: control target
= control target key end

     0   :  { %s1417_s21 = smov 0   ;;  %s1655_s0 = inlined_call_operand.vmem [shape: f32[4,32,256], index: 0, kind: input, shape index: {}]   ;;  %s1656_s1 = inlined_call_operand.vmem [shape: bf16[128,32], index: 1, kind: input, shape index: {}]   ;;  %s1657_s2 = inlined_call_operand.vmem [shape: f32[128,1], index: 2, kind: input, shape index: {}]   ;;  %s1658_s3 = inlined_call_operand.vmem [shape: f32[64,32], index: 3, kind: input, shape index: {}]   ;;  %s1659_s4 = inlined_call_operand.vmem [shape: bf16[32,64], index: 4, kind: input, shape index: {}]   ;;  %s1660_s5 = inlined_call_operand.vmem [shape: f32[32,1], index: 5, kind: input, shape index: {}]   ;;  %s1661_s6 = inlined_call_operand.vmem [shape: f32[4,32,256], index: 6, kind: output, shape index: {}]  }
   0x1 LB: > { %s1239_s22 = sadd.s32 4294967295, %s1379_s21   ;;  %p1243_p0 = scmp.ge.s32.totalorder %s1379_s21, 1  ;;  %s1379_s21 = sphi %s1417_s21, %s16_s21  }
   0x2   : > { %p212_p1 = scmp.lt.s32.totalorder %s1379_s21, 5 }
   0x4   : > { %p213_p2 = pnand %p1243_p0, %p212_p1 }
   0x5   : > { %p242_p3 = scmp.lt.s32.totalorder (!%p213_p2), %s1239_s22, 3  ;;  %v1381_v0 = vmov (!%p213_p2), 0   ;;  %v317_v31 = vld [vmem:[%s1657_s2 + $0x20] sm:$0xff] (!%p213_p2)  ;;  %v319_v32 = vld [vmem:[%s1657_s2 + $0x30] sm:$0xff] (!%p213_p2)  ;;  %v318_v41 = vld [vmem:[%s1657_s2 + $0x28] sm:$0xff] (!%p213_p2)  ;;  %vm449_vm0 = vcmask (!%p213_p2), 261120  }
   0x6   : > { %216 = sbr.rel (%p213_p2) target bundleno = 1030 (0x406), region = 44  ;;  %506 = vmatprep.mubr.bf16.mxu0 (!%p213_p2), %v1381_v0  ;;  %1361 = vset.pattern.permute.xlu0 (!%p213_p2), %v1381_v0  ;;  %v320_v44 = vld [vmem:[%s1657_s2 + $0x38] sm:$0xff] (!%p213_p2)  ;;  %v321_v49 = vld [vmem:[%s1657_s2 + $0x40] sm:$0xff] (!%p213_p2)  ;;  %v322_v50 = vld [vmem:[%s1657_s2 + $0x48] sm:$0xff] (!%p213_p2)  ;;  %vm1116_vm1 = vcmask (!%p213_p2), 523264  }
   0x7   : > { %1362 = vset.pattern.permute.xlu1 (!%p213_p2), %v1381_v0  ;;  %351 = vperm.xlu0 (!%p213_p2), %1361, %v317_v31   ;;  %v1363_v51 = vld [vmem:[%s1656_s1] sm:$0xff] (!%p213_p2)   ;;  %v323_v52 = vld [vmem:[%s1657_s2 + $0x50] sm:$0xff] (!%p213_p2)  ;;  %v324_v53 = vld [vmem:[%s1657_s2 + $0x58] sm:$0xff] (!%p213_p2) }
   0x8   : > { %361 = vperm.xlu1 (!%p213_p2), %1362, %v319_v32   ;;  %v325_v54 = vld [vmem:[%s1657_s2 + $0x60] sm:$0xff] (!%p213_p2)  ;;  %v326_v55 = vld [vmem:[%s1657_s2 + $0x68] sm:$0xff] (!%p213_p2)  ;;  %v327_v57 = vld [vmem:[%s1657_s2 + $0x70] sm:$0xff] (!%p213_p2) }
   0x9   : > { %v1364_v56 = vld [vmem:[%s1656_s1 + $0x8] sm:$0xff] (!%p213_p2)   ;;  %v328_v58 = vld [vmem:[%s1657_s2 + $0x78] sm:$0xff] (!%p213_p2)  ;;  %v313_v59 = vld [vmem:[%s1657_s2] sm:$0xff] (!%p213_p2) }
   0xa   : > { %v314_v60 = vld [vmem:[%s1657_s2 + $0x8] sm:$0xff] (!%p213_p2)  ;;  %v1365_v61 = vld [vmem:[%s1656_s1 + $0x10] sm:$0xff] (!%p213_p2)   ;;  %v316_v63 = vld [vmem:[%s1657_s2 + $0x18] sm:$0xff] (!%p213_p2) }
   0xb   : > { %356 = vperm.xlu0 (!%p213_p2), %1361, %v318_v41   ;;  %v315_v62 = vld [vmem:[%s1657_s2 + $0x10] sm:$0xff] (!%p213_p2) }
   0xc   : > { %366 = vperm.xlu1 (!%p213_p2), %1362, %v320_v44  }
   0xd   : > { %s1663_s22 = smov (!%p242_p3, %s1239_s22), 3 }
   0xe   : > { %s1278_s23 = sshll.u32 %s1663_s22, 6 }
   0xf   : > { %s246_s26 = scalar_lea.vmem %s1655_s0, %s1278_s23  ;;  %371 = vperm.xlu0 %1361, %v321_v49   ;;  %s251_s18 = scalar_lea.vmem %s1661_s6, %s1278_s23 }
  0x10   : > { %v254_v1 = vld [vmem:[%s246_s26 + $0x8] sm:$0xff]  ;;  %v256_v2 = vld [vmem:[%s246_s26 + $0x18] sm:$0xff]  ;;  %v253_v3 = vld [vmem:[%s246_s26] sm:$0xff]  ;;  %376 = vperm.xlu1 %1362, %v322_v50  }
  0x11   : > { %v262_v4 = vmax.f32 %v254_v1, 0.0  ;;  %v264_v5 = vmax.f32 %v256_v2, 0.0  ;;  %v255_v6 = vld [vmem:[%s246_s26 + $0x10] sm:$0xff]  ;;  %v261_v7 = vmax.f32 %v253_v3, 0.0  ;;  %v258_v8 = vld [vmem:[%s246_s26 + $0x28] sm:$0xff]  ;;  %v260_v9 = vld [vmem:[%s246_s26 + $0x38] sm:$0xff] }
  0x12   : > { %v263_v10 = vmax.f32 %v255_v6, 0.0  ;;  %v266_v11 = vmax.f32 %v258_v8, 0.0  ;;  %v268_v12 = vmax.f32 %v260_v9, 0.0  ;;  %v257_v13 = vld [vmem:[%s246_s26 + $0x20] sm:$0xff]  ;;  %v259_v14 = vld [vmem:[%s246_s26 + $0x30] sm:$0xff]  ;;  %v1083_v2 = vld [vmem:[%s1660_s5 + $0x8] sm:$0xff] }
  0x13   : > { %v270_v15 = vmin.f32 %v262_v4, 4.0  ;;  %v272_v16 = vmin.f32 %v264_v5, 4.0  ;;  %v269_v17 = vmin.f32 %v261_v7, 4.0  ;;  %v265_v18 = vmax.f32 %v257_v13, 0.0  ;;  %381 = vperm.xlu0 %1361, %v323_v52   ;;  %v1082_v1 = vld [vmem:[%s1660_s5] sm:$0xff]  ;;  %v1366_v3 = vld [vmem:[%s1656_s1 + $0x18] sm:$0xff]  }
  0x14   : > { %v271_v19 = vmin.f32 %v263_v10, 4.0  ;;  %v274_v20 = vmin.f32 %v266_v11, 4.0  ;;  %v276_v21 = vmin.f32 %v268_v12, 4.0  ;;  %v267_v22 = vmax.f32 %v259_v14, 0.0  ;;  %386 = vperm.xlu1 %1362, %v324_v53   ;;  %v1084_v4 = vld [vmem:[%s1660_s5 + $0x10] sm:$0xff]  ;;  %v1085_v5 = vld [vmem:[%s1660_s5 + $0x18] sm:$0xff] }
  0x15   : > { %v1297_v23 = vround.rtne.f32 %v270_v15  ;;  %v1299_v24 = vround.rtne.f32 %v272_v16  ;;  %v1296_v25 = vround.rtne.f32 %v269_v17  ;;  %v273_v26 = vmin.f32 %v265_v18, 4.0  ;;  %v1367_v6 = vld [vmem:[%s1656_s1 + $0x20] sm:$0xff]   ;;  %v1368_v7 = vld [vmem:[%s1656_s1 + $0x28] sm:$0xff]   ;;  %v1369_v8 = vld [vmem:[%s1656_s1 + $0x30] sm:$0xff]  }
  0x16   : > { %v1298_v27 = vround.rtne.f32 %v271_v19  ;;  %v1301_v28 = vround.rtne.f32 %v274_v20  ;;  %v1303_v29 = vround.rtne.f32 %v276_v21  ;;  %v275_v30 = vmin.f32 %v267_v22, 4.0  ;;  %v1370_v9 = vld [vmem:[%s1656_s1 + $0x38] sm:$0xff]  }
  0x17   : > { %v286_v33 = vmul.f32 0.25, %v1297_v23  ;;  %v288_v34 = vmul.f32 0.25, %v1299_v24  ;;  %v285_v35 = vmul.f32 0.25, %v1296_v25  ;;  %v1300_v36 = vround.rtne.f32 %v273_v26  ;;  %391 = vperm.xlu0 %1361, %v325_v54  }
  0x18   : > { %v287_v37 = vmul.f32 0.25, %v1298_v27  ;;  %v290_v38 = vmul.f32 0.25, %v1301_v28  ;;  %v292_v39 = vmul.f32 0.25, %v1303_v29  ;;  %v1302_v40 = vround.rtne.f32 %v275_v30  ;;  %396 = vperm.xlu1 %1362, %v326_v55  }
  0x19   : > { %v294_v42 = vpack.c.bf16 %v288_v34, %v286_v33  ;;  %v289_v43 = vmul.f32 0.25, %v1300_v36 }
  0x1a   : > { %v293_v45 = vpack.c.bf16 %v287_v37, %v285_v35  ;;  %v296_v46 = vpack.c.bf16 %v292_v39, %v290_v38  ;;  %v291_v47 = vmul.f32 0.25, %v1302_v40 }
  0x1b   : > { %474 = vmatprep.subr.bf16.mxu0 %v294_v42  ;;  %401 = vperm.xlu0 %1361, %v327_v57  }
  0x1c   : > { %475 = vmatpush1.bf16.msra.mxu0 %v293_v45  ;;  %v295_v48 = vpack.c.bf16 %v291_v47, %v289_v43  ;;  %406 = vperm.xlu1 %1362, %v328_v58  }
  0x1d   : > { %476 = vmatprep.subr.bf16.mxu0 %v296_v46 }
  0x1f   : > { %331 = vperm.xlu0 %1361, %v313_v59  }
  0x20   : > { %477 = vmatpush1.bf16.msra.mxu0 %v295_v48  ;;  %336 = vperm.xlu1 %1362, %v314_v60  }
  0x23   : > { %1256 = vmatmul.mubr.msk.bf16.vlgmr.msra.gmra.mrb[0].mxu0 %vm449_vm0, %v1363_v51  ;;  %341 = vperm.xlu0 %1361, %v315_v62  }
  0x24   : > { %516 = vmatprep.mubr.bf16.mxu0 %v1381_v0  ;;  %346 = vperm.xlu1 %1362, %v316_v63  }
  0x27   : > { %1088 = vperm.xlu0 %1361, %v1082_v1  }
  0x28   : > { %1093 = vperm.xlu1 %1362, %v1083_v2  }
  0x2b   : > { %1257 = vmatmul.mubr.msk.bf16.gmra.mrb[4].mxu0 %vm449_vm0, %v1364_v56  ;;  %1098 = vperm.xlu0 %1361, %v1084_v4  }
  0x2c   : > { %526 = vmatprep.mubr.bf16.mxu0 %v1381_v0  ;;  %1103 = vperm.xlu1 %1362, %v1085_v5  }
  0x33   : > { %1258 = vmatmul.mubr.msk.bf16.gmra.mrb[8].mxu0 %vm449_vm0, %v1365_v61 }
  0x34   : > { %536 = vmatprep.mubr.bf16.mxu0 %v1381_v0 }
  0x3b   : > { %1259 = vmatmul.mubr.msk.bf16.gmra.mrb[12].mxu0 %vm449_vm0, %v1366_v3 }
  0x3c   : > { %546 = vmatprep.mubr.bf16.mxu0 %v1381_v0 }
  0x43   : > { %1260 = vmatmul.mubr.msk.bf16.gmra.mrb[16].mxu0 %vm449_vm0, %v1367_v6 }
  0x44   : > { %556 = vmatprep.mubr.bf16.mxu0 %v1381_v0 }
  0x4b   : > { %1261 = vmatmul.mubr.msk.bf16.gmra.mrb[20].mxu0 %vm449_vm0, %v1368_v7 }
  0x4c   : > { %566 = vmatprep.mubr.bf16.mxu0 %v1381_v0 }
  0x53   : > { %1262 = vmatmul.mubr.msk.bf16.gmra.mrb[24].mxu0 %vm449_vm0, %v1369_v8 }
  0x54   : > { %576 = vmatprep.mubr.bf16.mxu0 %v1381_v0 }
  0x5b   : > { %1263 = vmatmul.mubr.msk.bf16.gmra.mrb[28].mxu0 %vm449_vm0, %v1370_v9 }
  0x5c   : > { %1155 = vmatprep.mubr.bf16.mxu0 %v1381_v0 }
  0x86   : > { %v1536_v10 = vpop.permute.xlu0 %351 }
  0x87   : > { %v1538_v11 = vpop.permute.xlu1 %361 }
  0x8a   : > { %v1540_v12 = vpop.permute.xlu0 %356 }
  0x8b   : > { %v1542_v13 = vpop.permute.xlu1 %366 }
  0x8e   : > { %v1544_v14 = vpop.permute.xlu0 %371 }
  0x8f   : > { %v1546_v15 = vpop.permute.xlu1 %376 }
  0x92   : > { %v1548_v16 = vpop.permute.xlu0 %381 }
  0x93   : > { %v1550_v17 = vpop.permute.xlu1 %386 }
  0x96   : > { %v1552_v18 = vpop.permute.xlu0 %391 }
  0x97   : > { %v1554_v19 = vpop.permute.xlu1 %396 }
  0x9a   : > { %v1556_v20 = vpop.permute.xlu0 %401 }
  0x9b   : > { %v1558_v21 = vpop.permute.xlu1 %406 }
  0x9e   : > { %v332_v22 = vpop.permute.xlu0 %331 }
  0x9f   : > { %v337_v24 = vpop.permute.xlu1 %336 }
  0xa2   : > { %v342_v38 = vpop.permute.xlu0 %341 }
  0xa3   : > { %v347_v44 = vpop.permute.xlu1 %346 }
  0xf6   : > { %v508_v23 = vpop.f32.mrb[0].mxu0 }
  0xf7   : > { %v509_v25 = vadd.f32 %v508_v23, %v332_v22  ;;  %v510_v26 = vpop.f32.mrb[1].mxu0 }
  0xf8   : > { %v511_v27 = vadd.f32 %v510_v26, %v332_v22  ;;  %v512_v28 = vpop.f32.mrb[2].mxu0 }
  0xf9   : > { %v587_v29 = vmax.f32 %v509_v25, 0.0  ;;  %v513_v30 = vadd.f32 %v512_v28, %v337_v24  ;;  %v514_v31 = vpop.f32.mrb[3].mxu0 }
  0xfa   : > { %v588_v32 = vmax.f32 %v511_v27, 0.0  ;;  %v515_v33 = vadd.f32 %v514_v31, %v337_v24 }
  0xfb   : > { %v619_v34 = vmin.f32 %v587_v29, 4.0  ;;  %v589_v35 = vmax.f32 %v513_v30, 0.0 }
  0xfc   : > { %v620_v36 = vmin.f32 %v588_v32, 4.0  ;;  %v590_v37 = vmax.f32 %v515_v33, 0.0 }
  0xfd   : > { %v1304_v39 = vround.rtne.f32 %v619_v34  ;;  %v621_v40 = vmin.f32 %v589_v35, 4.0 }
  0xfe   : > { %v1305_v41 = vround.rtne.f32 %v620_v36  ;;  %v622_v42 = vmin.f32 %v590_v37, 4.0  ;;  %v518_v43 = vpop.f32.mrb[4].mxu0 }
  0xff   : > { %v1306_v45 = vround.rtne.f32 %v621_v40  ;;  %v519_v46 = vadd.f32 %v518_v43, %v342_v38  ;;  %v520_v47 = vpop.f32.mrb[5].mxu0  ;;  %v683_v51 = vmul.f32 0.25, %v1304_v39 }
 0x100   : > { %v1307_v48 = vround.rtne.f32 %v622_v42  ;;  %v521_v49 = vadd.f32 %v520_v47, %v342_v38  ;;  %v522_v50 = vpop.f32.mrb[6].mxu0  ;;  %v684_v56 = vmul.f32 0.25, %v1305_v41 }
 0x101   : > { %v685_v52 = vmul.f32 0.25, %v1306_v45  ;;  %v591_v53 = vmax.f32 %v519_v46, 0.0  ;;  %v523_v54 = vadd.f32 %v522_v50, %v347_v44  ;;  %v524_v55 = vpop.f32.mrb[7].mxu0 }
 0x102   : > { %v686_v57 = vmul.f32 0.25, %v1307_v48  ;;  %v592_v58 = vmax.f32 %v521_v49, 0.0  ;;  %v525_v59 = vadd.f32 %v524_v55, %v347_v44 }
 0x103   : > { %v1560_v60 = vpack.c.bf16 %v685_v52, %v683_v51  ;;  %v623_v61 = vmin.f32 %v591_v53, 4.0  ;;  %v593_v62 = vmax.f32 %v523_v54, 0.0 }
 0x104   : > { %v624_v63 = vmin.f32 %v592_v58, 4.0  ;;  %v594_v1 = vmax.f32 %v525_v59, 0.0  ;;  %v1562_v2 = vpack.c.bf16 %v686_v57, %v684_v56 }
 0x105   : > { %v1308_v3 = vround.rtne.f32 %v623_v61  ;;  %v625_v4 = vmin.f32 %v593_v62, 4.0 }
 0x106   : > { %v1309_v5 = vround.rtne.f32 %v624_v63  ;;  %v626_v6 = vmin.f32 %v594_v1, 4.0  ;;  %v528_v7 = vpop.f32.mrb[8].mxu0 }
 0x107   : > { %v1310_v8 = vround.rtne.f32 %v625_v4  ;;  %v529_v9 = vadd.f32 %v528_v7, %v1536_v10  ;;  %v530_v22 = vpop.f32.mrb[9].mxu0  ;;  %v687_v26 = vmul.f32 0.25, %v1308_v3 }
 0x108   : > { %v1311_v23 = vround.rtne.f32 %v626_v6  ;;  %v531_v24 = vadd.f32 %v530_v22, %v1536_v10  ;;  %v532_v25 = vpop.f32.mrb[10].mxu0  ;;  %v688_v31 = vmul.f32 0.25, %v1309_v5 }
 0x109   : > { %v689_v27 = vmul.f32 0.25, %v1310_v8  ;;  %v595_v28 = vmax.f32 %v529_v9, 0.0  ;;  %v533_v29 = vadd.f32 %v532_v25, %v1540_v12  ;;  %v534_v30 = vpop.f32.mrb[11].mxu0 }
 0x10a   : > { %v690_v32 = vmul.f32 0.25, %v1311_v23  ;;  %v596_v33 = vmax.f32 %v531_v24, 0.0  ;;  %v535_v34 = vadd.f32 %v534_v30, %v1540_v12 }
 0x10b   : > { %v1568_v35 = vpack.c.bf16 %v689_v27, %v687_v26  ;;  %v627_v36 = vmin.f32 %v595_v28, 4.0  ;;  %v597_v37 = vmax.f32 %v533_v29, 0.0 }
 0x10c   : > { %v628_v38 = vmin.f32 %v596_v33, 4.0  ;;  %v598_v39 = vmax.f32 %v535_v34, 0.0  ;;  %v1570_v40 = vpack.c.bf16 %v690_v32, %v688_v31 }
 0x10d   : > { %v1312_v10 = vround.rtne.f32 %v627_v36  ;;  %v629_v41 = vmin.f32 %v597_v37, 4.0 }
 0x10e   : > { %v1313_v42 = vround.rtne.f32 %v628_v38  ;;  %v630_v43 = vmin.f32 %v598_v39, 4.0  ;;  %v538_v44 = vpop.f32.mrb[12].mxu0 }
 0x10f   : > { %v1314_v45 = vround.rtne.f32 %v629_v41  ;;  %v539_v46 = vadd.f32 %v538_v44, %v1538_v11  ;;  %v540_v47 = vpop.f32.mrb[13].mxu0  ;;  %v691_v50 = vmul.f32 0.25, %v1312_v10 }
 0x110   : > { %v1315_v48 = vround.rtne.f32 %v630_v43  ;;  %v541_v12 = vadd.f32 %v540_v47, %v1538_v11  ;;  %v542_v49 = vpop.f32.mrb[14].mxu0  ;;  %v692_v57 = vmul.f32 0.25, %v1313_v42 }
 0x111   : > { %v693_v51 = vmul.f32 0.25, %v1314_v45  ;;  %v599_v52 = vmax.f32 %v539_v46, 0.0  ;;  %v543_v53 = vadd.f32 %v542_v49, %v1542_v13  ;;  %v544_v54 = vpop.f32.mrb[15].mxu0 }
 0x112   : > { %v600_v55 = vmax.f32 %v541_v12, 0.0  ;;  %v545_v56 = vadd.f32 %v544_v54, %v1542_v13  ;;  %v694_v58 = vmul.f32 0.25, %v1315_v48 }
 0x113   : > { %v631_v59 = vmin.f32 %v599_v52, 4.0  ;;  %v601_v61 = vmax.f32 %v543_v53, 0.0  ;;  %v719_v62 = vpack.c.bf16 %v693_v51, %v691_v50 }
 0x114   : > { %v632_v63 = vmin.f32 %v600_v55, 4.0  ;;  %v602_v1 = vmax.f32 %v545_v56, 0.0  ;;  %v720_v3 = vpack.c.bf16 %v694_v58, %v692_v57 }
 0x115   : > { %v1316_v4 = vround.rtne.f32 %v631_v59  ;;  %v633_v11 = vmin.f32 %v601_v61, 4.0 }
 0x116   : > { %v1317_v5 = vround.rtne.f32 %v632_v63  ;;  %v634_v6 = vmin.f32 %v602_v1, 4.0  ;;  %v548_v7 = vpop.f32.mrb[16].mxu0  ;;  %731 = vmatprep.subr.bf16.mxu1 %v720_v3 }
 0x117   : > { %v1318_v8 = vround.rtne.f32 %v633_v11  ;;  %v549_v9 = vadd.f32 %v548_v7, %v1544_v14  ;;  %v550_v22 = vpop.f32.mrb[17].mxu0  ;;  %732 = vmatpush1.bf16.xpose.msra.mxu1 %v719_v62  ;;  %v695_v25 = vmul.f32 0.25, %v1316_v4 }
 0x118   : > { %v1319_v13 = vround.rtne.f32 %v634_v6  ;;  %v551_v23 = vadd.f32 %v550_v22, %v1544_v14  ;;  %v552_v24 = vpop.f32.mrb[18].mxu0  ;;  %v696_v30 = vmul.f32 0.25, %v1317_v5 }
 0x119   : > { %v697_v26 = vmul.f32 0.25, %v1318_v8  ;;  %v603_v27 = vmax.f32 %v549_v9, 0.0  ;;  %v553_v28 = vadd.f32 %v552_v24, %v1546_v15  ;;  %v554_v29 = vpop.f32.mrb[19].mxu0 }
 0x11a   : > { %v698_v31 = vmul.f32 0.25, %v1319_v13  ;;  %v604_v32 = vmax.f32 %v551_v23, 0.0  ;;  %v555_v33 = vadd.f32 %v554_v29, %v1546_v15 }
 0x11b   : > { %v635_v34 = vmin.f32 %v603_v27, 4.0  ;;  %v605_v36 = vmax.f32 %v553_v28, 0.0  ;;  %v721_v37 = vpack.c.bf16 %v697_v26, %v695_v25 }
 0x11c   : > { %v636_v38 = vmin.f32 %v604_v32, 4.0  ;;  %v606_v39 = vmax.f32 %v555_v33, 0.0  ;;  %v722_v10 = vpack.c.bf16 %v698_v31, %v696_v30 }
 0x11d   : > { %v1320_v41 = vround.rtne.f32 %v635_v34  ;;  %v637_v14 = vmin.f32 %v605_v36, 4.0 }
 0x11e   : > { %v1321_v42 = vround.rtne.f32 %v636_v38  ;;  %v638_v43 = vmin.f32 %v606_v39, 4.0  ;;  %v558_v44 = vpop.f32.mrb[20].mxu0  ;;  %733 = vmatprep.subr.bf16.mxu1 %v722_v10 }
 0x11f   : > { %v1322_v45 = vround.rtne.f32 %v637_v14  ;;  %v559_v46 = vadd.f32 %v558_v44, %v1548_v16  ;;  %v560_v47 = vpop.f32.mrb[21].mxu0  ;;  %734 = vmatpush1.bf16.xpose.msra.mxu1 %v721_v37  ;;  %v699_v49 = vmul.f32 0.25, %v1320_v41 }
 0x120   : > { %v1323_v48 = vround.rtne.f32 %v638_v43  ;;  %v561_v15 = vadd.f32 %v560_v47, %v1548_v16  ;;  %v562_v12 = vpop.f32.mrb[22].mxu0  ;;  %848 = vmatprep.subr.bf16.mxu1 %v1562_v2  ;;  %v700_v56 = vmul.f32 0.25, %v1321_v42 }
 0x121   : > { %v701_v50 = vmul.f32 0.25, %v1322_v45  ;;  %v607_v51 = vmax.f32 %v559_v46, 0.0  ;;  %v563_v52 = vadd.f32 %v562_v12, %v1550_v17  ;;  %v564_v53 = vpop.f32.mrb[23].mxu0 }
 0x122   : > { %v608_v54 = vmax.f32 %v561_v15, 0.0  ;;  %v565_v55 = vadd.f32 %v564_v53, %v1550_v17  ;;  %v702_v57 = vmul.f32 0.25, %v1323_v48 }
 0x123   : > { %v639_v58 = vmin.f32 %v607_v51, 4.0  ;;  %v609_v59 = vmax.f32 %v563_v52, 0.0  ;;  %v723_v61 = vpack.c.bf16 %v701_v50, %v699_v49 }
 0x124   : > { %v640_v62 = vmin.f32 %v608_v54, 4.0  ;;  %v610_v63 = vmax.f32 %v565_v55, 0.0  ;;  %v724_v16 = vpack.c.bf16 %v702_v57, %v700_v56 }
 0x125   : > { %v1324_v1 = vround.rtne.f32 %v639_v58  ;;  %v641_v3 = vmin.f32 %v609_v59, 4.0 }
 0x126   : > { %v1325_v4 = vround.rtne.f32 %v640_v62  ;;  %v642_v11 = vmin.f32 %v610_v63, 4.0  ;;  %v568_v5 = vpop.f32.mrb[24].mxu0  ;;  %763 = vmatprep.mubr.bf16.mxu1 %v724_v16 }
 0x127   : > { %v1326_v6 = vround.rtne.f32 %v641_v3  ;;  %v569_v7 = vadd.f32 %v568_v5, %v1552_v18  ;;  %v570_v8 = vpop.f32.mrb[25].mxu0  ;;  %764 = vmatmul.mubr.bf16.vlgmr.msra.gmra.mrb[0].mxu1 %v723_v61  ;;  %v703_v13 = vmul.f32 0.25, %v1324_v1 }
 0x128   : > { %v1327_v17 = vround.rtne.f32 %v642_v11  ;;  %v571_v9 = vadd.f32 %v570_v8, %v1552_v18  ;;  %849 = vmatpush1.bf16.msra.mxu1 %v1560_v60  ;;  %v572_v22 = vpop.f32.mrb[26].mxu0  ;;  %v704_v27 = vmul.f32 0.25, %v1325_v4 }
 0x129   : > { %v705_v23 = vmul.f32 0.25, %v1326_v6  ;;  %v611_v24 = vmax.f32 %v569_v7, 0.0  ;;  %v573_v25 = vadd.f32 %v572_v22, %v1554_v19  ;;  %850 = vmatprep.subr.bf16.mxu1 %v1570_v40  ;;  %v574_v26 = vpop.f32.mrb[27].mxu0  ;;  %v796_v6 = vld [vmem:[%s1658_s3] sm:$0xff]  ;;  %v797_v7 = vld [vmem:[%s1658_s3 + $0x8] sm:$0xff] }
 0x12a   : > { %v706_v28 = vmul.f32 0.25, %v1327_v17  ;;  %v612_v29 = vmax.f32 %v571_v9, 0.0  ;;  %v575_v30 = vadd.f32 %v574_v26, %v1554_v19 }
 0x12b   : > { %v643_v31 = vmin.f32 %v611_v24, 4.0  ;;  %v613_v32 = vmax.f32 %v573_v25, 0.0  ;;  %v725_v33 = vpack.c.bf16 %v705_v23, %v703_v13 }
 0x12c   : > { %v644_v18 = vmin.f32 %v612_v29, 4.0  ;;  %v614_v34 = vmax.f32 %v575_v30, 0.0  ;;  %851 = vmatpush1.bf16.msra.mxu1 %v1568_v35  ;;  %v726_v36 = vpack.c.bf16 %v706_v28, %v704_v27  ;;  %v798_v27 = vld [vmem:[%s1658_s3 + $0x10] sm:$0xff]  ;;  %v799_v28 = vld [vmem:[%s1658_s3 + $0x18] sm:$0xff] }
 0x12d   : > { %v1328_v37 = vround.rtne.f32 %v643_v31  ;;  %v645_v38 = vmin.f32 %v613_v32, 4.0  ;;  %933 = vmatprep.subr.bf16.mxu1 %v1562_v2 }
 0x12e   : > { %v1329_v39 = vround.rtne.f32 %v644_v18  ;;  %v646_v10 = vmin.f32 %v614_v34, 4.0  ;;  %v578_v41 = vpop.f32.mrb[28].mxu0  ;;  %771 = vmatprep.mubr.bf16.mxu1 %v726_v36 }
 0x12f   : > { %v1330_v14 = vround.rtne.f32 %v645_v38  ;;  %v579_v42 = vadd.f32 %v578_v41, %v1556_v20  ;;  %v580_v19 = vpop.f32.mrb[29].mxu0  ;;  %772 = vmatmul.mubr.bf16.gmra.mrb[4].mxu1 %v725_v33  ;;  %v707_v46 = vmul.f32 0.25, %v1328_v37  ;;  %v800_v41 = vld [vmem:[%s1658_s3 + $0x20] sm:$0xff] }
 0x130   : > { %v1331_v43 = vround.rtne.f32 %v646_v10  ;;  %v581_v44 = vadd.f32 %v580_v19, %v1556_v20  ;;  %v582_v45 = vpop.f32.mrb[30].mxu0  ;;  %v708_v2 = vmul.f32 0.25, %v1329_v39 }
 0x131   : > { %v709_v47 = vmul.f32 0.25, %v1330_v14  ;;  %v615_v48 = vmax.f32 %v579_v42, 0.0  ;;  %v583_v15 = vadd.f32 %v582_v45, %v1558_v21  ;;  %v584_v12 = vpop.f32.mrb[31].mxu0  ;;  %v801_v14 = vld [vmem:[%s1658_s3 + $0x28] sm:$0xff] }
 0x132   : > { %v710_v49 = vmul.f32 0.25, %v1331_v43  ;;  %v616_v50 = vmax.f32 %v581_v44, 0.0  ;;  %v585_v51 = vadd.f32 %v584_v12, %v1558_v21 }
 0x133   : > { %v647_v52 = vmin.f32 %v615_v48, 4.0  ;;  %v617_v53 = vmax.f32 %v583_v15, 0.0  ;;  %v727_v54 = vpack.c.bf16 %v709_v47, %v707_v46 }
 0x134   : > { %v648_v55 = vmin.f32 %v616_v50, 4.0  ;;  %v618_v56 = vmax.f32 %v585_v51, 0.0  ;;  %v728_v57 = vpack.c.bf16 %v710_v49, %v708_v2  ;;  %v802_v2 = vld [vmem:[%s1658_s3 + $0x30] sm:$0xff] }
 0x135   : > { %v1332_v58 = vround.rtne.f32 %v647_v52  ;;  %v649_v20 = vmin.f32 %v617_v53, 4.0 }
 0x136   : > { %v1333_v59 = vround.rtne.f32 %v648_v55  ;;  %v650_v61 = vmin.f32 %v618_v56, 4.0  ;;  %779 = vmatprep.mubr.bf16.mxu1 %v728_v57 }
 0x137   : > { %v1334_v62 = vround.rtne.f32 %v649_v20  ;;  %780 = vmatmul.mubr.bf16.gmra.mrb[8].mxu1 %v727_v54  ;;  %v711_v16 = vmul.f32 0.25, %v1332_v58 }
 0x138   : > { %v1335_v63 = vround.rtne.f32 %v650_v61  ;;  %v712_v3 = vmul.f32 0.25, %v1333_v59 }
 0x139   : > { %v713_v1 = vmul.f32 0.25, %v1334_v62 }
 0x13a   : > { %v714_v4 = vmul.f32 0.25, %v1335_v63 }
 0x13b   : > { %v729_v11 = vpack.c.bf16 %v713_v1, %v711_v16 }
 0x13c   : > { %v730_v21 = vpack.c.bf16 %v714_v4, %v712_v3 }
 0x13e   : > { %787 = vmatprep.mubr.bf16.mxu1 %v730_v21 }
 0x13f   : > { %788 = vmatmul.mubr.bf16.gmra.mrb[12].mxu1 %v729_v11 }
 0x140   : > { %880 = vmatprep.mubr.bf16.mxu1 %v1381_v0 }
 0x1fa   : > { %v765_v5 = vpop.f32.mrb[0].mxu1 }
 0x1fb   : > { %v767_v8 = vpop.f32.mrb[1].mxu1  ;;  %v804_v9 = vmul.f32 %v796_v6, %v765_v5 }
 0x1fc   : > { %v768_v17 = vpop.f32.mrb[2].mxu1 }
 0x1fd   : > { %v805_v22 = vmul.f32 %v797_v7, %v768_v17  ;;  %v770_v13 = vpop.f32.mrb[3].mxu1 }
 0x1ff   : > { %v812_v23 = vpack.c.bf16 %v805_v22, %v804_v9 }
 0x201   : > { %v816_v24 = vunpack.c.l.bf16 %v812_v23  ;;  %v817_v25 = vunpack.c.h.bf16 %v812_v23 }
 0x202   : > { %v773_v26 = vpop.f32.mrb[4].mxu1 }
 0x203   : > { %v824_v29 = vsub.f32 %v804_v9, %v816_v24  ;;  %v825_v30 = vsub.f32 %v805_v22, %v817_v25  ;;  %v775_v31 = vpop.f32.mrb[5].mxu1  ;;  %v806_v18 = vmul.f32 %v798_v27, %v773_v26 }
 0x204   : > { %v776_v32 = vpop.f32.mrb[6].mxu1 }
 0x205   : > { %v832_v33 = vpack.c.bf16 %v825_v30, %v824_v29  ;;  %v807_v34 = vmul.f32 %v799_v28, %v776_v32  ;;  %v778_v36 = vpop.f32.mrb[7].mxu1 }
 0x207   : > { %v813_v37 = vpack.c.bf16 %v807_v34, %v806_v18  ;;  %1264 = vmatmul.mubr.msk.bf16.vlgmr.msra.gmra.mrb[16].mxu1 %vm449_vm0, %v832_v33 }
 0x208   : > { %934 = vmatpush1.bf16.msra.mxu1 %v1560_v60  ;;  %890 = vmatprep.mubr.bf16.mxu1 %v1381_v0 }
 0x209   : > { %v818_v38 = vunpack.c.l.bf16 %v813_v37  ;;  %v819_v39 = vunpack.c.h.bf16 %v813_v37  ;;  %935 = vmatprep.subr.bf16.mxu1 %v1570_v40 }
 0x20a   : > { %v781_v10 = vpop.f32.mrb[8].mxu1 }
 0x20b   : > { %v826_v42 = vsub.f32 %v806_v18, %v818_v38  ;;  %v827_v19 = vsub.f32 %v807_v34, %v819_v39  ;;  %v783_v43 = vpop.f32.mrb[9].mxu1  ;;  %v808_v45 = vmul.f32 %v800_v41, %v781_v10 }
 0x20c   : > { %936 = vmatpush1.bf16.msra.mxu1 %v1568_v35  ;;  %v784_v60 = vpop.f32.mrb[10].mxu1  ;;  %v803_v35 = vld [vmem:[%s1658_s3 + $0x38] sm:$0xff] }
 0x20d   : > { %v833_v44 = vpack.c.bf16 %v827_v19, %v826_v42  ;;  %v809_v46 = vmul.f32 %v801_v14, %v784_v60  ;;  %v786_v47 = vpop.f32.mrb[11].mxu1 }
 0x20f   : > { %v814_v40 = vpack.c.bf16 %v809_v46, %v808_v45  ;;  %1265 = vmatmul.mubr.msk.bf16.gmra.mrb[20].mxu1 %vm449_vm0, %v833_v44 }
 0x210   : > { %900 = vmatprep.mubr.bf16.mxu1 %v1381_v0 }
 0x211   : > { %v820_v48 = vunpack.c.l.bf16 %v814_v40  ;;  %v821_v15 = vunpack.c.h.bf16 %v814_v40 }
 0x212   : > { %v789_v12 = vpop.f32.mrb[12].mxu1 }
 0x213   : > { %v828_v49 = vsub.f32 %v808_v45, %v820_v48  ;;  %v829_v50 = vsub.f32 %v809_v46, %v821_v15  ;;  %v791_v51 = vpop.f32.mrb[13].mxu1  ;;  %v810_v54 = vmul.f32 %v802_v2, %v789_v12 }
 0x214   : > { %v792_v52 = vpop.f32.mrb[14].mxu1 }
 0x215   : > { %v834_v53 = vpack.c.bf16 %v829_v50, %v828_v49  ;;  %v811_v55 = vmul.f32 %v803_v35, %v792_v52  ;;  %v794_v56 = vpop.f32.mrb[15].mxu1 }
 0x217   : > { %v815_v57 = vpack.c.bf16 %v811_v55, %v810_v54  ;;  %1266 = vmatmul.mubr.msk.bf16.gmra.mrb[24].mxu1 %vm449_vm0, %v834_v53 }
 0x218   : > { %910 = vmatprep.mubr.bf16.mxu1 %v1381_v0 }
 0x219   : > { %v822_v58 = vunpack.c.l.bf16 %v815_v57  ;;  %v823_v20 = vunpack.c.h.bf16 %v815_v57 }
 0x21b   : > { %v830_v59 = vsub.f32 %v810_v54, %v822_v58  ;;  %v831_v61 = vsub.f32 %v811_v55, %v823_v20 }
 0x21d   : > { %v835_v62 = vpack.c.bf16 %v831_v61, %v830_v59 }
 0x21f   : > { %1267 = vmatmul.mubr.msk.bf16.gmra.mrb[28].mxu1 %vm449_vm0, %v835_v62 }
 0x220   : > { %965 = vmatprep.mubr.bf16.mxu1 %v1381_v0 }
 0x227   : > { %1268 = vmatmul.mubr.msk.bf16.vlgmr.msra.gmra.mrb[16].mxu1 %vm449_vm0, %v812_v23 }
 0x228   : > { %975 = vmatprep.mubr.bf16.mxu1 %v1381_v0 }
 0x22f   : > { %1269 = vmatmul.mubr.msk.bf16.gmra.mrb[20].mxu1 %vm449_vm0, %v813_v37 }
 0x230   : > { %985 = vmatprep.mubr.bf16.mxu1 %v1381_v0 }
 0x237   : > { %1270 = vmatmul.mubr.msk.bf16.gmra.mrb[24].mxu1 %vm449_vm0, %v814_v40 }
 0x238   : > { %995 = vmatprep.mubr.bf16.mxu1 %v1381_v0 }
 0x23f   : > { %1271 = vmatmul.mubr.msk.bf16.gmra.mrb[28].mxu1 %vm449_vm0, %v815_v57 }
 0x2fa   : > { %v967_v63 = vpop.f32.mrb[16].mxu1 }
 0x2fb   : > { %v1006_v16 = vmax.f32 %v967_v63, 0.0  ;;  %v969_v1 = vpop.f32.mrb[17].mxu1 }
 0x2fc   : > { %v1007_v3 = vmax.f32 %v969_v1, 0.0  ;;  %v971_v4 = vpop.f32.mrb[18].mxu1 }
 0x2fd   : > { %v1022_v11 = vmin.f32 %v1006_v16, 4.0  ;;  %v1008_v21 = vmax.f32 %v971_v4, 0.0  ;;  %v973_v5 = vpop.f32.mrb[19].mxu1 }
 0x2fe   : > { %v1023_v6 = vmin.f32 %v1007_v3, 4.0  ;;  %v1009_v7 = vmax.f32 %v973_v5, 0.0 }
 0x2ff   : > { %v1336_v8 = vround.rtne.f32 %v1022_v11  ;;  %v1024_v17 = vmin.f32 %v1008_v21, 4.0 }
 0x300   : > { %v1337_v9 = vround.rtne.f32 %v1023_v6  ;;  %v1025_v22 = vmin.f32 %v1009_v7, 4.0 }
 0x301   : > { %v1338_v13 = vround.rtne.f32 %v1024_v17  ;;  %v1054_v25 = vmul.f32 0.25, %v1336_v8 }
 0x302   : > { %v1339_v23 = vround.rtne.f32 %v1025_v22  ;;  %v977_v24 = vpop.f32.mrb[20].mxu1  ;;  %v1055_v29 = vmul.f32 0.25, %v1337_v9 }
 0x303   : > { %v1056_v26 = vmul.f32 0.25, %v1338_v13  ;;  %v1010_v27 = vmax.f32 %v977_v24, 0.0  ;;  %v979_v28 = vpop.f32.mrb[21].mxu1 }
 0x304   : > { %v1057_v30 = vmul.f32 0.25, %v1339_v23  ;;  %v1011_v31 = vmax.f32 %v979_v28, 0.0  ;;  %v981_v32 = vpop.f32.mrb[22].mxu1 }
 0x305   : > { %v1070_v33 = vpack.c.bf16 %v1056_v26, %v1054_v25  ;;  %v1026_v18 = vmin.f32 %v1010_v27, 4.0  ;;  %v1012_v34 = vmax.f32 %v981_v32, 0.0  ;;  %v983_v36 = vpop.f32.mrb[23].mxu1 }
 0x306   : > { %v1027_v37 = vmin.f32 %v1011_v31, 4.0  ;;  %v1013_v38 = vmax.f32 %v983_v36, 0.0  ;;  %v1071_v39 = vpack.c.bf16 %v1057_v30, %v1055_v29 }
 0x307   : > { %v1340_v10 = vround.rtne.f32 %v1026_v18  ;;  %v1028_v41 = vmin.f32 %v1012_v34, 4.0  ;;  %v1372_v18 = vld [vmem:[%s1659_s4 + $0x8] sm:$0xff]   ;;  %v1089_v34 = vpop.permute.xlu0 %1088 }
 0x308   : > { %v1341_v14 = vround.rtne.f32 %v1027_v37  ;;  %v1029_v42 = vmin.f32 %v1013_v38, 4.0  ;;  %1123 = vmatprep.subr.bf16.mxu0 %v1071_v39  ;;  %v1094_v39 = vpop.permute.xlu1 %1093 }
 0x309   : > { %v1342_v19 = vround.rtne.f32 %v1028_v41  ;;  %1124 = vmatpush1.bf16.msra.mxu0 %v1070_v33  ;;  %v1058_v44 = vmul.f32 0.25, %v1340_v10  ;;  %v1371_v33 = vld [vmem:[%s1659_s4] sm:$0xff]  }
 0x30a   : > { %v1343_v43 = vround.rtne.f32 %v1029_v42  ;;  %v987_v60 = vpop.f32.mrb[24].mxu1  ;;  %v1059_v40 = vmul.f32 0.25, %v1341_v14 }
 0x30b   : > { %v1060_v45 = vmul.f32 0.25, %v1342_v19  ;;  %v1014_v46 = vmax.f32 %v987_v60, 0.0  ;;  %v989_v47 = vpop.f32.mrb[25].mxu1  ;;  %v1099_v19 = vpop.permute.xlu0 %1098 }
 0x30c   : > { %v1061_v48 = vmul.f32 0.25, %v1343_v43  ;;  %v1015_v15 = vmax.f32 %v989_v47, 0.0  ;;  %v991_v12 = vpop.f32.mrb[26].mxu1 }
 0x30d   : > { %v1072_v2 = vpack.c.bf16 %v1060_v45, %v1058_v44  ;;  %v1030_v35 = vmin.f32 %v1014_v46, 4.0  ;;  %v1016_v49 = vmax.f32 %v991_v12, 0.0  ;;  %v993_v50 = vpop.f32.mrb[27].mxu1  ;;  %v1104_v45 = vpop.permute.xlu1 %1103 }
 0x30e   : > { %v1031_v51 = vmin.f32 %v1015_v15, 4.0  ;;  %v1017_v52 = vmax.f32 %v993_v50, 0.0  ;;  %v1073_v53 = vpack.c.bf16 %v1061_v48, %v1059_v40 }
 0x30f   : > { %v1344_v54 = vround.rtne.f32 %v1030_v35  ;;  %v1032_v55 = vmin.f32 %v1016_v49, 4.0 }
 0x310   : > { %v1345_v56 = vround.rtne.f32 %v1031_v51  ;;  %v1033_v57 = vmin.f32 %v1017_v52, 4.0  ;;  %1125 = vmatprep.subr.bf16.mxu0 %v1073_v53 }
 0x311   : > { %v1346_v58 = vround.rtne.f32 %v1032_v55  ;;  %1126 = vmatpush1.bf16.msra.mxu0 %v1072_v2  ;;  %v1062_v61 = vmul.f32 0.25, %v1344_v54 }
 0x312   : > { %v1347_v20 = vround.rtne.f32 %v1033_v57  ;;  %v997_v59 = vpop.f32.mrb[28].mxu1  ;;  %v1063_v1 = vmul.f32 0.25, %v1345_v56 }
 0x313   : > { %v1064_v62 = vmul.f32 0.25, %v1346_v58  ;;  %v1018_v63 = vmax.f32 %v997_v59, 0.0  ;;  %v999_v16 = vpop.f32.mrb[29].mxu1 }
 0x314   : > { %v1065_v3 = vmul.f32 0.25, %v1347_v20  ;;  %v1019_v4 = vmax.f32 %v999_v16, 0.0  ;;  %v1001_v11 = vpop.f32.mrb[30].mxu1 }
 0x315   : > { %v1074_v21 = vpack.c.bf16 %v1064_v62, %v1062_v61  ;;  %v1034_v5 = vmin.f32 %v1018_v63, 4.0  ;;  %v1020_v6 = vmax.f32 %v1001_v11, 0.0  ;;  %v1003_v7 = vpop.f32.mrb[31].mxu1 }
 0x316   : > { %v1035_v8 = vmin.f32 %v1019_v4, 4.0  ;;  %v1021_v17 = vmax.f32 %v1003_v7, 0.0  ;;  %v1075_v9 = vpack.c.bf16 %v1065_v3, %v1063_v1 }
 0x317   : > { %v1348_v22 = vround.rtne.f32 %v1034_v5  ;;  %v1036_v13 = vmin.f32 %v1020_v6, 4.0 }
 0x318   : > { %v1349_v23 = vround.rtne.f32 %v1035_v8  ;;  %v1037_v24 = vmin.f32 %v1021_v17, 4.0  ;;  %1127 = vmatprep.subr.bf16.mxu0 %v1075_v9 }
 0x319   : > { %v1350_v25 = vround.rtne.f32 %v1036_v13  ;;  %1128 = vmatpush1.bf16.msra.mxu0 %v1074_v21  ;;  %v1066_v27 = vmul.f32 0.25, %v1348_v22 }
 0x31a   : > { %v1351_v26 = vround.rtne.f32 %v1037_v24  ;;  %v1067_v29 = vmul.f32 0.25, %v1349_v23 }
 0x31b   : > { %v1068_v28 = vmul.f32 0.25, %v1350_v25 }
 0x31c   : > { %v1069_v30 = vmul.f32 0.25, %v1351_v26 }
 0x31d   : > { %v1076_v31 = vpack.c.bf16 %v1068_v28, %v1066_v27 }
 0x31e   : > { %v1077_v32 = vpack.c.bf16 %v1069_v30, %v1067_v29 }
 0x320   : > { %1129 = vmatprep.subr.bf16.mxu0 %v1077_v32 }
 0x321   : > { %1130 = vmatpush1.bf16.msra.mxu0 %v1076_v31 }
 0x324   : > { %1274 = vmatmul.mubr.msk.bf16.vlgmr.msra.gmra.mrb[32].mxu0 %vm1116_vm1, %v1371_v33 }
 0x325   : > { %1165 = vmatprep.mubr.bf16.mxu0 %v1381_v0 }
 0x32c   : > { %1275 = vmatmul.mubr.msk.bf16.gmra.mrb[36].mxu0 %vm1116_vm1, %v1372_v18 }
 0x3f7   : > { %v1157_v36 = vpop.f32.mrb[32].mxu0 }
 0x3f8   : > { %v1158_v37 = vadd.f32 %v1157_v36, %v1089_v34  ;;  %v1159_v38 = vpop.f32.mrb[33].mxu0 }
 0x3f9   : > { %v1160_v10 = vadd.f32 %v1159_v38, %v1089_v34  ;;  %v1161_v41 = vpop.f32.mrb[34].mxu0 }
 0x3fa   : > { %1176 = vst [vmem:[%s251_s18] sm:$0xff] %v1158_v37  ;;  %v1162_v14 = vadd.f32 %v1161_v41, %v1094_v39  ;;  %v1163_v0 = vpop.f32.mrb[35].mxu0 }
 0x3fb   : > { %1177 = vst [vmem:[%s251_s18 + $0x8] sm:$0xff] %v1160_v10  ;;  %v1164_v42 = vadd.f32 %v1163_v0, %v1094_v39 }
 0x3fc   : > { %1178 = vst [vmem:[%s251_s18 + $0x10] sm:$0xff] %v1162_v14 }
 0x3fd   : > { %1179 = vst [vmem:[%s251_s18 + $0x18] sm:$0xff] %v1164_v42 }
 0x3ff   : > { %v1167_v43 = vpop.f32.mrb[36].mxu0 }
 0x400   : > { %v1168_v60 = vadd.f32 %v1167_v43, %v1099_v19  ;;  %v1169_v44 = vpop.f32.mrb[37].mxu0 }
 0x401   : > { %v1170_v46 = vadd.f32 %v1169_v44, %v1099_v19  ;;  %v1171_v47 = vpop.f32.mrb[38].mxu0 }
 0x402   : > { %1180 = vst [vmem:[%s251_s18 + $0x20] sm:$0xff] %v1168_v60  ;;  %v1172_v40 = vadd.f32 %v1171_v47, %v1104_v45  ;;  %v1173_v48 = vpop.f32.mrb[39].mxu0 }
 0x403   : > { %1181 = vst [vmem:[%s251_s18 + $0x28] sm:$0xff] %v1170_v46  ;;  %v1174_v15 = vadd.f32 %v1173_v48, %v1104_v45 }
 0x404   : > { %1182 = vst [vmem:[%s251_s18 + $0x30] sm:$0xff] %v1172_v40 }
 0x405   : > { %1183 = vst [vmem:[%s251_s18 + $0x38] sm:$0xff] %v1174_v15 }
 0x406 PF: > { %s16_s21 = sadd.s32 1, %s1379_s21  }
 0x407   : > { %p13_p4 = scmp.ge.s32.totalorder %s16_s21, 6  }
 0x409   :  { %15 = sbr.rel (!%p13_p4) target bundleno = 1 (0x1), region = 74 }

</bundles_post_ra>
